<compile_context>
chip_gen: v7x
topology: tpu7x:2x2x1
jax: 0.10.0
libtpu: 0.0.40
codegen_flags: <defaults>
</compile_context>

<pallas_src>
import functools

import jax
import jax.numpy as jnp
from jax.experimental import pallas as pl
from jax.experimental.pallas import tpu as pltpu

# bf16 chunks per f32 table (hi/mid/lo): sum reconstructs f32 to ~2^-24 relative,
# so the 1e-5 tolerance of the f32 reference is met with 3 MXU passes.
_NUM_CHUNKS = 3


def _w2v_tile_kernel(ids_ref, emb_in_ref, emb_out_ref, o_ref, *, d_pad, num_chunks):
    """One batch tile.

    ids_ref     : (2, TB) int32 token ids (row 0 = center, row 1 = context)
    emb_*_ref   : (num_chunks * d_pad, V) bf16 chunked transposed tables (resident)
    o_ref       : (1, TB) float32 scores (lane-dense output block)
    """
    v = emb_in_ref.shape[1]
    tb = ids_ref.shape[1]

    # Transposed one-hot selectors (V, TB): column b has a 1 at row id[b].
    # 0/1 are exact in bf16, so the MXU gather below is exact per chunk.
    vocab_iota = jax.lax.broadcasted_iota(jnp.int32, (v, tb), 0)
    onehot_c = (vocab_iota == ids_ref[0:1, :]).astype(jnp.bfloat16)   # (V, TB)
    onehot_x = (vocab_iota == ids_ref[1:2, :]).astype(jnp.bfloat16)   # (V, TB)

    def gather(tab_ref, onehot):
        # Row gather via MXU: sum over bf16 chunks of (d_pad, V) @ (V, TB) -> f32.
        acc = jnp.zeros((d_pad, tb), jnp.float32)
        for c in range(num_chunks):
            acc = acc + jnp.dot(tab_ref[c * d_pad:(c + 1) * d_pad, :], onehot,
                                preferred_element_type=jnp.float32)
        return acc                                                     # (d_pad, TB)

    g_in = gather(emb_in_ref, onehot_c)
    g_out = gather(emb_out_ref, onehot_x)

    # Score: VPU multiply + sublane reduce -> lane-dense (1, TB) store.
    # Padded D rows are zero in both tables, so they contribute nothing.
    o_ref[...] = jnp.sum(g_in * g_out, axis=0, keepdims=True)


def _round_up(x, m):
    return ((x + m - 1) // m) * m


def _vmem_capacity_bytes():
    """Per-core VMEM capacity; conservative (v7x) fallback if query fails."""
    try:
        cap = int(getattr(pltpu.get_tpu_info(), "vmem_capacity_bytes"))
        if cap > 0:
            return cap
    except Exception:
        pass
    return 64 * 2 ** 20


def _chunked_table(table, d_pad, num_chunks):
    """(V, D) float -> (num_chunks * d_pad, V) bf16 transposed hi/mid/lo chunks."""
    v, d = table.shape
    t = table.astype(jnp.float32).T                                   # (D, V)
    if d_pad != d:
        t = jnp.concatenate([t, jnp.zeros((d_pad - d, v), jnp.float32)], axis=0)
    chunks, resid = [], t
    for _ in range(num_chunks):
        c = resid.astype(jnp.bfloat16)
        chunks.append(c)
        resid = resid - c.astype(jnp.float32)
    return jnp.concatenate(chunks, axis=0)                            # (C*d_pad, V)


@functools.partial(jax.jit, static_argnames=("tile_b",))
def word2vec_forward(x, input_embedding, output_embedding, *, tile_b=None):
    """x: (B, 2) integer ids; embeddings: (V, D) float. Returns (B,) float32."""
    x = jnp.asarray(x).astype(jnp.int32)
    b = x.shape[0]
    v, d = input_embedding.shape
    d_pad = _round_up(d, 8)

    # ---- generation-aware VMEM budget (all byte math is trace-time Python) ----
    cap = _vmem_capacity_bytes()
    budget = int(cap * 0.85)
    # Tables: 2 tables x num_chunks bf16 copies, single-buffered (Buffered(1)).
    table_bytes = 2 * _NUM_CHUNKS * d_pad * v * 2
    # Per-batch-element tile intermediates:
    #   iota (V,TB) i32 + two bf16 one-hots (V,TB)            -> 8*V
    #   two chunked f32 gather accumulators, product, etc.    -> (8*C + 16)*d_pad
    per_elem = 8 * v + (8 * _NUM_CHUNKS + 16) * d_pad + 64
    # Double-buffered id (2,TB) i32 and out (1,TB) f32 tiles.
    io_per_elem = 2 * (2 * 4 + 4)
    slack = 4 * 2 ** 20

    if table_bytes + (per_elem + io_per_elem) * 128 + slack > budget:
        # TODO(synk): large-vocab path — keep tables in HBM (memory_space=pl.ANY)
        # and do a manual double-buffered DMA row gather per batch tile instead
        # of the VMEM-resident one-hot matmul gather.
        raise NotImplementedError(
            f"embedding tables ({table_bytes / 2**20:.1f} MiB) too large for the "
            f"VMEM-resident one-hot path (budget {budget / 2**20:.1f} MiB)")

    if tile_b is None:
        # Biggest lane-multiple tile that fits, capped at 2048; keep >= 2 grid
        # steps when the batch allows it so v7x megacore can use both TCs.
        tile_cap = (budget - slack - table_bytes) // (per_elem + io_per_elem)
        tile_b = int(min(2048, max(128, (tile_cap // 128) * 128)))
        tile_b = int(min(tile_b, max(128, _round_up(pl.cdiv(b, 2), 128))))
    if tile_b % 128 != 0 or tile_b <= 0:
        raise ValueError(f"tile_b must be a positive multiple of 128, got {tile_b}")

    needed = table_bytes + (per_elem + io_per_elem) * tile_b + slack
    if needed > budget:
        raise ValueError(
            f"tile_b={tile_b} needs ~{needed / 2**20:.1f} MiB VMEM but the budget "
            f"is {budget / 2**20:.1f} MiB — pass a smaller tile_b")
    vmem_limit = int(min(int(cap * 0.9), max(needed, 32 * 2 ** 20)))

    padded_b = _round_up(b, tile_b)
    num_tiles = padded_b // tile_b

    # One (2, padded_B) id array: row 0 = center, row 1 = context (pad id = 0;
    # padded results are sliced off below).
    ids = jnp.pad(x.T, ((0, 0), (0, padded_b - b)))

    emb_in_c = _chunked_table(input_embedding, d_pad, _NUM_CHUNKS)
    emb_out_c = _chunked_table(output_embedding, d_pad, _NUM_CHUNKS)

    kernel = functools.partial(_w2v_tile_kernel, d_pad=d_pad, num_chunks=_NUM_CHUNKS)

    out = pl.pallas_call(
        kernel,
        grid_spec=pltpu.PrefetchScalarGridSpec(
            num_scalar_prefetch=0,
            grid=(num_tiles,),
            in_specs=[
                # One small id DMA per step (center + context together).
                pl.BlockSpec((2, tile_b), lambda t: (0, t)),
                # Resident chunked tables: constant block, single-buffered.
                pl.BlockSpec((_NUM_CHUNKS * d_pad, v), lambda t: (0, 0),
                             pipeline_mode=pl.Buffered(1)),
                pl.BlockSpec((_NUM_CHUNKS * d_pad, v), lambda t: (0, 0),
                             pipeline_mode=pl.Buffered(1)),
            ],
            out_specs=pl.BlockSpec((1, tile_b), lambda t: (0, t)),
        ),
        out_shape=jax.ShapeDtypeStruct((1, padded_b), jnp.float32),
        compiler_params=pltpu.CompilerParams(
            dimension_semantics=("parallel",),
            vmem_limit_bytes=vmem_limit,
        ),
    )(ids, emb_in_c, emb_out_c)

    return out[0, :b]


if __name__ == "__main__":
    vocab_size = 64
    embedding_dim = 128
    batch = 200          # spans two batch tiles (megacore-splittable grid)

    key = jax.random.PRNGKey(0)
    k_in, k_out, k_idx = jax.random.split(key, 3)

    # nn.Embedding default init is N(0, 1).
    input_embedding = jax.random.normal(
        k_in, (vocab_size, embedding_dim), dtype=jnp.float32)
    output_embedding = jax.random.normal(
        k_out, (vocab_size, embedding_dim), dtype=jnp.float32)

    # (batch, 2) token-id pairs, as consumed by the PyTorch forward.
    x = jax.random.randint(k_idx, (batch, 2), 0, vocab_size, dtype=jnp.int32)

    result = word2vec_forward(x, input_embedding, output_embedding)
    result = jax.block_until_ready(result)

    # Pure-JAX reference of the PyTorch semantics.
    ref = jnp.sum(input_embedding[x[:, 0]] * output_embedding[x[:, 1]], axis=1)
    assert result.shape == (batch,)
    assert jnp.allclose(result, ref, rtol=1e-5, atol=1e-5), \
        float(jnp.max(jnp.abs(result - ref)))

    print("KERNEL_OK")
</pallas_src>

<mosaic_0001>
module attributes {stable_mosaic.version = 11 : i64} {
  func.func @_w2v_tile_kernel(%arg0: i32, %arg1: memref<2x128xi32, #tpu.memory_space<vmem>>, %arg2: memref<384x64xbf16, #tpu.memory_space<vmem>>, %arg3: memref<384x64xbf16, #tpu.memory_space<vmem>>, %arg4: memref<1x128xf32, #tpu.memory_space<vmem>>) attributes {dimension_semantics = [#tpu.dimension_semantics<parallel>], iteration_bounds = array<i64: 2>, scalar_prefetch = 0 : i64, scratch_operands = 0 : i64, tpu.core_type = #tpu.core_type<tc>, window_params = [{transform_indices = @transform_0, window_bounds = array<i64: 2, 128>}, {pipeline_mode = #tpu.pipeline_mode<synchronous>, transform_indices = @transform_1, window_bounds = array<i64: 384, 64>}, {pipeline_mode = #tpu.pipeline_mode<synchronous>, transform_indices = @transform_2, window_bounds = array<i64: 384, 64>}, {transform_indices = @transform_3, window_bounds = array<i64: 1, 128>}]} {
    %0 = tpu.iota {dimensions = array<i32: 0>} : vector<64x128xi32>
    %c0 = arith.constant 0 : index
    %c0_0 = arith.constant 0 : index
    %1 = vector.load %arg1[%c0, %c0_0] : memref<2x128xi32, #tpu.memory_space<vmem>>, vector<1x128xi32>
    %2 = vector.broadcast %1 : vector<1x128xi32> to vector<64x128xi32>
    %3 = arith.cmpi eq, %0, %2 : vector<64x128xi32>
    %4 = arith.extui %3 : vector<64x128xi1> to vector<64x128xi32>
    %5 = arith.sitofp %4 : vector<64x128xi32> to vector<64x128xf32>
    %6 = arith.truncf %5 : vector<64x128xf32> to vector<64x128xbf16>
    %c1 = arith.constant 1 : index
    %c0_1 = arith.constant 0 : index
    %7 = vector.load %arg1[%c1, %c0_1] : memref<2x128xi32, #tpu.memory_space<vmem>>, vector<1x128xi32>
    %8 = vector.broadcast %7 : vector<1x128xi32> to vector<64x128xi32>
    %9 = arith.cmpi eq, %0, %8 : vector<64x128xi32>
    %10 = arith.extui %9 : vector<64x128xi1> to vector<64x128xi32>
    %11 = arith.sitofp %10 : vector<64x128xi32> to vector<64x128xf32>
    %12 = arith.truncf %11 : vector<64x128xf32> to vector<64x128xbf16>
    %cst = arith.constant 0.000000e+00 : f32
    %13 = vector.broadcast %cst : f32 to vector<128x128xf32>
    %c0_2 = arith.constant 0 : index
    %c0_3 = arith.constant 0 : index
    %14 = vector.load %arg2[%c0_2, %c0_3] : memref<384x64xbf16, #tpu.memory_space<vmem>>, vector<128x64xbf16>
    %cst_4 = arith.constant dense<0.000000e+00> : vector<128x128xf32>
    %15 = tpu.matmul %14, %6, %cst_4 {dimension_numbers = #tpu.dot_dimension_numbers<[1], [0], [0], [1], [0, 0, 1, 1], [], []>} : vector<128x64xbf16>, vector<64x128xbf16>, vector<128x128xf32> -> vector<128x128xf32>
    %16 = arith.addf %13, %15 : vector<128x128xf32>
    %c128 = arith.constant 128 : index
    %c0_5 = arith.constant 0 : index
    %17 = vector.load %arg2[%c128, %c0_5] : memref<384x64xbf16, #tpu.memory_space<vmem>>, vector<128x64xbf16>
    %cst_6 = arith.constant dense<0.000000e+00> : vector<128x128xf32>
    %18 = tpu.matmul %17, %6, %cst_6 {dimension_numbers = #tpu.dot_dimension_numbers<[1], [0], [0], [1], [0, 0, 1, 1], [], []>} : vector<128x64xbf16>, vector<64x128xbf16>, vector<128x128xf32> -> vector<128x128xf32>
    %19 = arith.addf %16, %18 : vector<128x128xf32>
    %c256 = arith.constant 256 : index
    %c0_7 = arith.constant 0 : index
    %20 = vector.load %arg2[%c256, %c0_7] : memref<384x64xbf16, #tpu.memory_space<vmem>>, vector<128x64xbf16>
    %cst_8 = arith.constant dense<0.000000e+00> : vector<128x128xf32>
    %21 = tpu.matmul %20, %6, %cst_8 {dimension_numbers = #tpu.dot_dimension_numbers<[1], [0], [0], [1], [0, 0, 1, 1], [], []>} : vector<128x64xbf16>, vector<64x128xbf16>, vector<128x128xf32> -> vector<128x128xf32>
    %22 = arith.addf %19, %21 : vector<128x128xf32>
    %cst_9 = arith.constant 0.000000e+00 : f32
    %23 = vector.broadcast %cst_9 : f32 to vector<128x128xf32>
    %c0_10 = arith.constant 0 : index
    %c0_11 = arith.constant 0 : index
    %24 = vector.load %arg3[%c0_10, %c0_11] : memref<384x64xbf16, #tpu.memory_space<vmem>>, vector<128x64xbf16>
    %cst_12 = arith.constant dense<0.000000e+00> : vector<128x128xf32>
    %25 = tpu.matmul %24, %12, %cst_12 {dimension_numbers = #tpu.dot_dimension_numbers<[1], [0], [0], [1], [0, 0, 1, 1], [], []>} : vector<128x64xbf16>, vector<64x128xbf16>, vector<128x128xf32> -> vector<128x128xf32>
    %26 = arith.addf %23, %25 : vector<128x128xf32>
    %c128_13 = arith.constant 128 : index
    %c0_14 = arith.constant 0 : index
    %27 = vector.load %arg3[%c128_13, %c0_14] : memref<384x64xbf16, #tpu.memory_space<vmem>>, vector<128x64xbf16>
    %cst_15 = arith.constant dense<0.000000e+00> : vector<128x128xf32>
    %28 = tpu.matmul %27, %12, %cst_15 {dimension_numbers = #tpu.dot_dimension_numbers<[1], [0], [0], [1], [0, 0, 1, 1], [], []>} : vector<128x64xbf16>, vector<64x128xbf16>, vector<128x128xf32> -> vector<128x128xf32>
    %29 = arith.addf %26, %28 : vector<128x128xf32>
    %c256_16 = arith.constant 256 : index
    %c0_17 = arith.constant 0 : index
    %30 = vector.load %arg3[%c256_16, %c0_17] : memref<384x64xbf16, #tpu.memory_space<vmem>>, vector<128x64xbf16>
    %cst_18 = arith.constant dense<0.000000e+00> : vector<128x128xf32>
    %31 = tpu.matmul %30, %12, %cst_18 {dimension_numbers = #tpu.dot_dimension_numbers<[1], [0], [0], [1], [0, 0, 1, 1], [], []>} : vector<128x64xbf16>, vector<64x128xbf16>, vector<128x128xf32> -> vector<128x128xf32>
    %32 = arith.addf %29, %31 : vector<128x128xf32>
    %33 = arith.mulf %22, %32 : vector<128x128xf32>
    %cst_19 = arith.constant dense<0.000000e+00> : vector<128xf32>
    %34 = vector.multi_reduction <add>, %33, %cst_19 [0] : vector<128x128xf32> to vector<128xf32>
    %35 = vector.shape_cast %34 : vector<128xf32> to vector<1x128xf32>
    %c0_20 = arith.constant 0 : index
    %c0_21 = arith.constant 0 : index
    %36 = vector.load %arg4[%c0_20, %c0_21] : memref<1x128xf32, #tpu.memory_space<vmem>>, vector<1x128xf32>
    tpu.vector_store %arg4[%c0_20, %c0_21], %35 {strides = array<i32>} : memref<1x128xf32, #tpu.memory_space<vmem>>, vector<1x128xf32>,
    return
  }
  func.func @transform_0(%arg0: i32) -> (i32, i32) {
    %c0_i32 = arith.constant 0 : i32
    %c0_i32_0 = arith.constant 0 : i32
    return %c0_i32, %arg0 : i32, i32
  }
  func.func @transform_1(%arg0: i32) -> (i32, i32) {
    %c0_i32 = arith.constant 0 : i32
    %c0_i32_0 = arith.constant 0 : i32
    %c0_i32_1 = arith.constant 0 : i32
    return %c0_i32, %c0_i32_0 : i32, i32
  }
  func.func @transform_2(%arg0: i32) -> (i32, i32) {
    %c0_i32 = arith.constant 0 : i32
    %c0_i32_0 = arith.constant 0 : i32
    %c0_i32_1 = arith.constant 0 : i32
    return %c0_i32, %c0_i32_0 : i32, i32
  }
  func.func @transform_3(%arg0: i32) -> (i32, i32) {
    %c0_i32 = arith.constant 0 : i32
    %c0_i32_0 = arith.constant 0 : i32
    return %c0_i32, %arg0 : i32, i32
  }
}

</mosaic_0001>

<bundles_post_ra>
// kernel: word2vec_forward.1
= control target key start
LH: loop header
LB: loop body
LE: loop exit
PB: predicated region body
PF: predicated region fallthrough
CT: control target
= control target key end

     0   :  { %8 = vsyncpa [#allocation3], 0  ;;  %s2536_s0 = inlined_call_operand.vmem [shape: s32[2,256], index: 0, kind: input, shape index: {}]   ;;  %s2537_s1 = inlined_call_operand.vmem [shape: bf16[384,64], index: 1, kind: input, shape index: {}]   ;;  %s2538_s2 = inlined_call_operand.vmem [shape: bf16[384,64], index: 2, kind: input, shape index: {}]   ;;  %s2539_s3 = inlined_call_operand.hbm [shape: f32[1,256], index: 3, kind: output, shape index: {}]  }
   0x1   :  { %10 = vsyncpa [#allocation3 + $0x1], 0  ;;  %s2066_s12 = smov 0   ;;  %s2068_s13 = smov 0  }
   0x2   :  { %s2070_s14 = smov 0   ;;  %s2072_s15 = smov 0  }
   0x3 LB: > { %s2087_s16 = sadd.s32 4294967295, %s2042_s15   ;;  %s1442_s17 = sadd.s32 4294967294, %s2042_s15   ;;  %s2042_s15 = sphi %s2072_s15, %s2561_s15   ;;  %s2038_s14 = sphi %s2070_s14, %s2560_s14   ;;  %s2034_s13 = sphi %s2068_s13, %s2559_s13   ;;  %s2030_s12 = sphi %s2066_s12, %s2558_s12  }
   0x4   : > { %s2091_s18 = sadd.s32 1, %s2042_s15   ;;  %s91_s19 = sadd.s32 1, %s2038_s14 }
   0x5   : > { %s88_s20 = ssub.s32 %s2042_s15, %s2091_s18  ;;  %p101_p0 = scmp.ne.s32.totalorder %s2038_s14, %s2034_s13 }
   0x6   : > { %p89_p1 = scmp.eq.s32.totalorder %s88_s20, 0  ;;  %p102_p2 = scmp.eq.s32.totalorder %s2087_s16, 1 }
   0x7   : > { %p107_p3 = scmp.ne.s32.totalorder %s2034_s13, %s2030_s12  ;;  %p108_p4 = scmp.eq.s32.totalorder %s1442_s17, 1 }
   0x8   : > { %s2102_s21 = scalar_select %p89_p1, %s2038_s14, %s91_s19  }
   0x9   : > { %p2104_p5 = por %p102_p2, %p101_p0  ;;  %p2108_p6 = por %p108_p4, %p107_p3 }
   0xa   : > { %p1445_p7 = scmp.ge.s32.totalorder %s2042_s15, 1  ;;  %p139_p8 = scmp.lt.s32.totalorder %s2042_s15, 3 }
   0xc   : > { %p140_p9 = pnand %p1445_p7, %p139_p8 }
   0xd   : > { %p161_p10 = scmp.lt.s32.totalorder (!%p140_p9), %s2087_s16, 1  ;;  %v166_v0 = vlaneseq (!%p140_p9)  ;;  %v1932_v1 = vld [vmem:[%s2537_s1 + $0x40] sm:$0xff] (!%p140_p9)   ;;  %vm313_vm0 = vcmask (!%p140_p9), 523264   ;;  %v2044_v12 = vmov (!%p140_p9), 1.0|1.0   ;;  %v1934_v22 = vld [vmem:[%s2537_s1 + $0x48] sm:$0xff] (!%p140_p9)  }
   0xe   : > { %143 = sbr.rel (%p140_p9) target bundleno = 382 (0x17e), region = 32  ;;  %v1933_v2 = vld [vmem:[%s2538_s2 + $0x40] sm:$0xff] (!%p140_p9)   ;;  %1692 = vmatprep.mubr.msk.bf16.mxu0 (!%p140_p9), %vm313_vm0, %v1932_v1  ;;  %v1935_v23 = vld [vmem:[%s2538_s2 + $0x48] sm:$0xff] (!%p140_p9)   ;;  %v1936_v24 = vld [vmem:[%s2537_s1 + $0x50] sm:$0xff] (!%p140_p9)   ;;  %s159_s8 = sand.u32 (!%p140_p9), 1, %s2034_s13  }
   0xf   : > { %v167_v3 = vshrl.u32 (!%p140_p9), %v166_v0, 7  ;;  %1764 = vmatprep.mubr.msk.bf16.mxu1 (!%p140_p9), %vm313_vm0, %v1933_v2  ;;  %v1937_v25 = vld [vmem:[%s2538_s2 + $0x50] sm:$0xff] (!%p140_p9)   ;;  %v1938_v26 = vld [vmem:[%s2537_s1 + $0x58] sm:$0xff] (!%p140_p9)   ;;  %v1940_v28 = vld [vmem:[%s2537_s1 + $0x60] sm:$0xff] (!%p140_p9)   ;;  %s1609_s9 = sshll.u32 (!%p140_p9), %s2087_s16, 4  ;;  %s160_s10 = scalar_lea.vmem (!%p140_p9), [#allocation2], %s159_s8 }
  0x10   : > { %v1939_v27 = vld [vmem:[%s2538_s2 + $0x58] sm:$0xff] (!%p140_p9)   ;;  %v1941_v29 = vld [vmem:[%s2538_s2 + $0x60] sm:$0xff] (!%p140_p9)   ;;  %v1942_v30 = vld [vmem:[%s2537_s1 + $0x68] sm:$0xff] (!%p140_p9)   ;;  %s1387_s11 = sshll.u32 (!%p140_p9), %s160_s10, 4  ;;  %s2494_s20 = scalar_lea.hbm (!%p140_p9), %s2539_s3, %s1609_s9  ;;  %s2496_s11 = int_to_ptr.vmem [resolvable:$true] %s1387_s11 }
  0x11   : > { %v168_v4 = vadd.s32 (!%p140_p9), 8, %v167_v3  ;;  %v169_v5 = vadd.s32 (!%p140_p9), 16, %v167_v3  ;;  %v170_v6 = vadd.s32 (!%p140_p9), 24, %v167_v3  ;;  %v171_v7 = vadd.s32 (!%p140_p9), 32, %v167_v3  ;;  %v1943_v31 = vld [vmem:[%s2538_s2 + $0x68] sm:$0xff] (!%p140_p9)   ;;  %v1944_v32 = vld [vmem:[%s2537_s1 + $0x70] sm:$0xff] (!%p140_p9)  }
  0x12   : > { %v172_v8 = vadd.s32 (!%p140_p9), 40, %v167_v3  ;;  %v173_v14 = vadd.s32 (!%p140_p9), 48, %v167_v3  ;;  %v174_v15 = vadd.s32 (!%p140_p9), 56, %v167_v3  ;;  %v1945_v33 = vld [vmem:[%s2538_s2 + $0x70] sm:$0xff] (!%p140_p9)   ;;  %v1946_v34 = vld [vmem:[%s2537_s1 + $0x78] sm:$0xff] (!%p140_p9)   ;;  %v1948_v36 = vld [vmem:[%s2537_s1] sm:$0xff] (!%p140_p9)  }
  0x13   : > { %v1947_v35 = vld [vmem:[%s2538_s2 + $0x78] sm:$0xff] (!%p140_p9)   ;;  %v1949_v37 = vld [vmem:[%s2538_s2] sm:$0xff] (!%p140_p9)   ;;  %v1950_v38 = vld [vmem:[%s2537_s1 + $0x8] sm:$0xff] (!%p140_p9)   ;;  %s1375_s24 = scalar_lea.sflag (!%p140_p9), [#allocation3], %s159_s8  ;;  %s1980_s25 = scalar_lea.vmem (!%p140_p9), %s2496_s11, 16 }
  0x14   : > { %v1951_v39 = vld [vmem:[%s2538_s2 + $0x8] sm:$0xff] (!%p140_p9)   ;;  %v1952_v40 = vld [vmem:[%s2537_s1 + $0x10] sm:$0xff] (!%p140_p9)   ;;  %v1954_v42 = vld [vmem:[%s2537_s1 + $0x18] sm:$0xff] (!%p140_p9)   ;;  %p1981_p11 = scmp.ne.s32.totalorder (!%p140_p9), %s2496_s11, %s1980_s25 }
  0x15   : > { %s162_s28 = scalar_select %p161_p10, %s2087_s16, 1  ;;  %v1953_v41 = vld [vmem:[%s2538_s2 + $0x10] sm:$0xff]   ;;  %v1955_v43 = vld [vmem:[%s2538_s2 + $0x18] sm:$0xff]   ;;  %v1956_v44 = vld [vmem:[%s2537_s1 + $0x20] sm:$0xff]  }
  0x16   : > { %v1957_v45 = vld [vmem:[%s2538_s2 + $0x20] sm:$0xff]   ;;  %v1958_v46 = vld [vmem:[%s2537_s1 + $0x28] sm:$0xff]   ;;  %v1960_v48 = vld [vmem:[%s2537_s1 + $0x30] sm:$0xff]   ;;  %p1982_p12 = pnand %p1981_p11, %p2104_p5  ;;  %s2045_s16 = smov [#allocation2]  }
  0x17   : > { %s1446_s29 = sshll.u32 %s162_s28, 1  ;;  %v1959_v47 = vld [vmem:[%s2538_s2 + $0x28] sm:$0xff]   ;;  %v1961_v49 = vld [vmem:[%s2538_s2 + $0x30] sm:$0xff]   ;;  %v1962_v50 = vld [vmem:[%s2537_s1 + $0x38] sm:$0xff]   ;;  %s1984_s26 = sshll.u32 %s2045_s16, 4  ;;  %s1985_s26 = int_to_ptr.vmem [resolvable:$false] %s1984_s26 }
  0x18   : > { %s164_s5 = scalar_lea.vmem %s2536_s0, %s1446_s29  ;;  %v1963_v51 = vld [vmem:[%s2538_s2 + $0x38] sm:$0xff]   ;;  %v1964_v52 = vld [vmem:[%s2537_s1 + $0x80] sm:$0xff]   ;;  %v1966_v54 = vld [vmem:[%s2537_s1 + $0x88] sm:$0xff]   ;;  %p1983_p13 = pneg %p1982_p12 }
  0x19   : > { %v1447_v9 = vld [vmem:[%s164_s5] ss:$0 sm:$0xff]  ;;  %v1456_v10 = vld [vmem:[%s164_s5 + $0x1] ss:$0 sm:$0xff]  ;;  %v1967_v55 = vld [vmem:[%s2538_s2 + $0x88] sm:$0xff]   ;;  %s1986_s27 = scalar_lea.vmem %s1985_s26, 32  ;;  %p1987_p0 = scmp.lt.s32.totalorder %s2496_s11, %s1985_s26 }
  0x1a   : > { %vm180_vm1 = vcmp.eq.s32.totalorder %v167_v3, %v1447_v9  ;;  %vm181_vm2 = vcmp.eq.s32.totalorder %v168_v4, %v1447_v9  ;;  %vm213_vm3 = vcmp.eq.s32.totalorder %v167_v3, %v1456_v10  ;;  %vm214_vm4 = vcmp.eq.s32.totalorder %v168_v4, %v1456_v10  ;;  %v1965_v53 = vld [vmem:[%s2538_s2 + $0x80] sm:$0xff]   ;;  %v1968_v56 = vld [vmem:[%s2537_s1 + $0x90] sm:$0xff]   ;;  %v1970_v58 = vld [vmem:[%s2537_s1 + $0x98] sm:$0xff]   ;;  %p1988_p1 = scmp.lt.s32.totalorder %s1986_s27, %s1980_s25 }
  0x1b   : > { %vm2127_vm5 = vmpackc.low %vm181_vm2, %vm180_vm1  ;;  %vm182_vm6 = vcmp.eq.s32.totalorder %v169_v5, %v1447_v9  ;;  %vm183_vm7 = vcmp.eq.s32.totalorder %v170_v6, %v1447_v9  ;;  %vm215_vm8 = vcmp.eq.s32.totalorder %v169_v5, %v1456_v10  ;;  %vm216_vm9 = vcmp.eq.s32.totalorder %v170_v6, %v1456_v10  ;;  %v1969_v57 = vld [vmem:[%s2538_s2 + $0x90] sm:$0xff]   ;;  %v1971_v59 = vld [vmem:[%s2538_s2 + $0x98] sm:$0xff]  }
  0x1c   : > { %1684 = vmatprep.subr.msk.bf16.mxu0 %vm2127_vm5, %v2044_v12  ;;  %vm2134_vm10 = vmpackc.low %vm214_vm4, %vm213_vm3  ;;  %vm184_vm11 = vcmp.eq.s32.totalorder %v171_v7, %v1447_v9  ;;  %vm185_vm12 = vcmp.eq.s32.totalorder %v172_v8, %v1447_v9  ;;  %vm217_vm14 = vcmp.eq.s32.totalorder %v171_v7, %v1456_v10  ;;  %vm218_vm15 = vcmp.eq.s32.totalorder %v172_v8, %v1456_v10  ;;  %v1972_v60 = vld [vmem:[%s2537_s1 + $0xa0] sm:$0xff]   ;;  %v1974_v62 = vld [vmem:[%s2537_s1 + $0xa8] sm:$0xff]   ;;  %p1989_p2 = por %p1988_p1, %p1987_p0 }
  0x1d   : > { %1756 = vmatprep.subr.msk.bf16.mxu1 %vm2134_vm10, %v2044_v12  ;;  %1685 = vmatpush3.bf16.msk.msra.mxu0 %vm2127_vm5, %v2044_v12  ;;  %vm2144_vm13 = vmpackc.low %vm183_vm7, %vm182_vm6  ;;  %vm186_vm4 = vcmp.eq.s32.totalorder %v173_v14, %v1447_v9  ;;  %vm187_vm6 = vcmp.eq.s32.totalorder %v174_v15, %v1447_v9  ;;  %vm219_vm7 = vcmp.eq.s32.totalorder %v173_v14, %v1456_v10  ;;  %v1973_v61 = vld [vmem:[%s2538_s2 + $0xa0] sm:$0xff]   ;;  %v1975_v63 = vld [vmem:[%s2538_s2 + $0xa8] sm:$0xff]  }
  0x1e   : > { %1757 = vmatpush3.bf16.msk.msra.mxu1 %vm2134_vm10, %v2044_v12  ;;  %1686 = vmatprep.subr.msk.bf16.mxu0 %vm2144_vm13, %v2044_v12  ;;  %vm2156_vm1 = vmpackc.low %vm216_vm9, %vm215_vm8  ;;  %vm220_vm8 = vcmp.eq.s32.totalorder %v174_v15, %v1456_v10  ;;  %v1976_v0 = vld [vmem:[%s2537_s1 + $0xb0] sm:$0xff]   ;;  %v1978_v2 = vld [vmem:[%s2537_s1 + $0xb8] sm:$0xff]   ;;  %p1990_p3 = pnand %p1989_p2, %p1983_p13 }
  0x1f   : > { %1758 = vmatprep.subr.msk.bf16.mxu1 %vm2156_vm1, %v2044_v12  ;;  %vm2163_vm2 = vmpackc.low %vm185_vm12, %vm184_vm11  ;;  %v1977_v1 = vld [vmem:[%s2538_s2 + $0xb0] sm:$0xff]   ;;  %v1979_v3 = vld [vmem:[%s2538_s2 + $0xb8] sm:$0xff]  }
  0x20   : > { %vm2167_vm3 = vmpackc.low %vm218_vm15, %vm217_vm14 }
  0x21   : > { %1687 = vmatpush3.bf16.msk.msra.mxu0 %vm2144_vm13, %v2044_v12  ;;  %vm2183_vm9 = vmpackc.low %vm187_vm6, %vm186_vm4 }
  0x22   : > { %1759 = vmatpush3.bf16.msk.msra.mxu1 %vm2156_vm1, %v2044_v12  ;;  %1688 = vmatprep.subr.msk.bf16.mxu0 %vm2163_vm2, %v2044_v12  ;;  %vm2187_vm11 = vmpackc.low %vm220_vm8, %vm219_vm7 }
  0x23   : > { %1760 = vmatprep.subr.msk.bf16.mxu1 %vm2167_vm3, %v2044_v12 }
  0x25   : > { %1689 = vmatpush3.bf16.msk.msra.mxu0 %vm2163_vm2, %v2044_v12 }
  0x26   : > { %1761 = vmatpush3.bf16.msk.msra.mxu1 %vm2167_vm3, %v2044_v12  ;;  %1690 = vmatprep.subr.msk.bf16.mxu0 %vm2183_vm9, %v2044_v12 }
  0x27   : > { %1762 = vmatprep.subr.msk.bf16.mxu1 %vm2187_vm11, %v2044_v12 }
  0x29   : > { %1691 = vmatpush3.bf16.msk.msra.mxu0 %vm2183_vm9, %v2044_v12 }
  0x2a   : > { %1763 = vmatpush3.bf16.msk.msra.mxu1 %vm2187_vm11, %v2044_v12  ;;  %1708 = vmatprep.subr.msk.bf16.mxu0 %vm2127_vm5, %v2044_v12 }
  0x2b   : > { %1780 = vmatprep.subr.msk.bf16.mxu1 %vm2134_vm10, %v2044_v12 }
  0x2c   : > { %1693 = vmatmul.mubr.msk.bf16.vlgmr.msra.gmra.mrb[0].mxu0 %vm313_vm0, %v1934_v22 }
  0x2d   : > { %1765 = vmatmul.mubr.msk.bf16.vlgmr.msra.gmra.mrb[0].mxu1 %vm313_vm0, %v1935_v23  ;;  %1709 = vmatpush3.bf16.msk.msra.mxu0 %vm2127_vm5, %v2044_v12 }
  0x2e   : > { %1781 = vmatpush3.bf16.msk.msra.mxu1 %vm2134_vm10, %v2044_v12  ;;  %1696 = vmatprep.mubr.msk.bf16.mxu0 %vm313_vm0, %v1936_v24 }
  0x2f   : > { %1768 = vmatprep.mubr.msk.bf16.mxu1 %vm313_vm0, %v1937_v25  ;;  %1710 = vmatprep.subr.msk.bf16.mxu0 %vm2144_vm13, %v2044_v12 }
  0x30   : > { %1782 = vmatprep.subr.msk.bf16.mxu1 %vm2156_vm1, %v2044_v12 }
  0x31   : > { %1711 = vmatpush3.bf16.msk.msra.mxu0 %vm2144_vm13, %v2044_v12 }
  0x32   : > { %1783 = vmatpush3.bf16.msk.msra.mxu1 %vm2156_vm1, %v2044_v12  ;;  %1712 = vmatprep.subr.msk.bf16.mxu0 %vm2163_vm2, %v2044_v12 }
  0x33   : > { %1784 = vmatprep.subr.msk.bf16.mxu1 %vm2167_vm3, %v2044_v12 }
  0x34   : > { %1697 = vmatmul.mubr.msk.bf16.gmra.mrb[4].mxu0 %vm313_vm0, %v1938_v26 }
  0x35   : > { %1769 = vmatmul.mubr.msk.bf16.gmra.mrb[4].mxu1 %vm313_vm0, %v1939_v27  ;;  %1700 = vmatprep.mubr.msk.bf16.mxu0 %vm313_vm0, %v1940_v28 }
  0x36   : > { %1772 = vmatprep.mubr.msk.bf16.mxu1 %vm313_vm0, %v1941_v29  ;;  %1713 = vmatpush3.bf16.msk.msra.mxu0 %vm2163_vm2, %v2044_v12 }
  0x37   : > { %1785 = vmatpush3.bf16.msk.msra.mxu1 %vm2167_vm3, %v2044_v12  ;;  %1714 = vmatprep.subr.msk.bf16.mxu0 %vm2183_vm9, %v2044_v12 }
  0x38   : > { %1786 = vmatprep.subr.msk.bf16.mxu1 %vm2187_vm11, %v2044_v12 }
  0x3a   : > { %1715 = vmatpush3.bf16.msk.msra.mxu0 %vm2183_vm9, %v2044_v12 }
  0x3b   : > { %1787 = vmatpush3.bf16.msk.msra.mxu1 %vm2187_vm11, %v2044_v12  ;;  %1732 = vmatprep.subr.msk.bf16.mxu0 %vm2127_vm5, %v2044_v12 }
  0x3c   : > { %1701 = vmatmul.mubr.msk.bf16.gmra.mrb[8].mxu0 %vm313_vm0, %v1942_v30  ;;  %1804 = vmatprep.subr.msk.bf16.mxu1 %vm2134_vm10, %v2044_v12 }
  0x3d   : > { %1773 = vmatmul.mubr.msk.bf16.gmra.mrb[8].mxu1 %vm313_vm0, %v1943_v31  ;;  %1704 = vmatprep.mubr.msk.bf16.mxu0 %vm313_vm0, %v1944_v32 }
  0x3e   : > { %1776 = vmatprep.mubr.msk.bf16.mxu1 %vm313_vm0, %v1945_v33 }
  0x44   : > { %1705 = vmatmul.mubr.msk.bf16.gmra.mrb[12].mxu0 %vm313_vm0, %v1946_v34 }
  0x45   : > { %1777 = vmatmul.mubr.msk.bf16.gmra.mrb[12].mxu1 %vm313_vm0, %v1947_v35  ;;  %1716 = vmatprep.mubr.msk.bf16.mxu0 %vm313_vm0, %v1948_v36 }
  0x46   : > { %1788 = vmatprep.mubr.msk.bf16.mxu1 %vm313_vm0, %v1949_v37 }
  0x4c   : > { %1717 = vmatmul.mubr.msk.bf16.vlgmr.msra.gmra.mrb[0].mxu0 %vm313_vm0, %v1950_v38 }
  0x4d   : > { %1789 = vmatmul.mubr.msk.bf16.vlgmr.msra.gmra.mrb[0].mxu1 %vm313_vm0, %v1951_v39  ;;  %1733 = vmatpush3.bf16.msk.msra.mxu0 %vm2127_vm5, %v2044_v12 }
  0x4e   : > { %1805 = vmatpush3.bf16.msk.msra.mxu1 %vm2134_vm10, %v2044_v12  ;;  %1720 = vmatprep.mubr.msk.bf16.mxu0 %vm313_vm0, %v1952_v40 }
  0x4f   : > { %1792 = vmatprep.mubr.msk.bf16.mxu1 %vm313_vm0, %v1953_v41  ;;  %1734 = vmatprep.subr.msk.bf16.mxu0 %vm2144_vm13, %v2044_v12 }
  0x50   : > { %1806 = vmatprep.subr.msk.bf16.mxu1 %vm2156_vm1, %v2044_v12 }
  0x51   : > { %1735 = vmatpush3.bf16.msk.msra.mxu0 %vm2144_vm13, %v2044_v12 }
  0x52   : > { %1807 = vmatpush3.bf16.msk.msra.mxu1 %vm2156_vm1, %v2044_v12  ;;  %1736 = vmatprep.subr.msk.bf16.mxu0 %vm2163_vm2, %v2044_v12 }
  0x53   : > { %1808 = vmatprep.subr.msk.bf16.mxu1 %vm2167_vm3, %v2044_v12 }
  0x54   : > { %1721 = vmatmul.mubr.msk.bf16.gmra.mrb[4].mxu0 %vm313_vm0, %v1954_v42 }
  0x55   : > { %1793 = vmatmul.mubr.msk.bf16.gmra.mrb[4].mxu1 %vm313_vm0, %v1955_v43  ;;  %1724 = vmatprep.mubr.msk.bf16.mxu0 %vm313_vm0, %v1956_v44 }
  0x56   : > { %1796 = vmatprep.mubr.msk.bf16.mxu1 %vm313_vm0, %v1957_v45  ;;  %1737 = vmatpush3.bf16.msk.msra.mxu0 %vm2163_vm2, %v2044_v12 }
  0x57   : > { %1809 = vmatpush3.bf16.msk.msra.mxu1 %vm2167_vm3, %v2044_v12  ;;  %1738 = vmatprep.subr.msk.bf16.mxu0 %vm2183_vm9, %v2044_v12 }
  0x58   : > { %1810 = vmatprep.subr.msk.bf16.mxu1 %vm2187_vm11, %v2044_v12 }
  0x5a   : > { %1739 = vmatpush3.bf16.msk.msra.mxu0 %vm2183_vm9, %v2044_v12 }
  0x5b   : > { %1811 = vmatpush3.bf16.msk.msra.mxu1 %vm2187_vm11, %v2044_v12 }
  0x5c   : > { %1725 = vmatmul.mubr.msk.bf16.gmra.mrb[8].mxu0 %vm313_vm0, %v1958_v46 }
  0x5d   : > { %1797 = vmatmul.mubr.msk.bf16.gmra.mrb[8].mxu1 %vm313_vm0, %v1959_v47  ;;  %1728 = vmatprep.mubr.msk.bf16.mxu0 %vm313_vm0, %v1960_v48 }
  0x5e   : > { %1800 = vmatprep.mubr.msk.bf16.mxu1 %vm313_vm0, %v1961_v49 }
  0x64   : > { %1729 = vmatmul.mubr.msk.bf16.gmra.mrb[12].mxu0 %vm313_vm0, %v1962_v50 }
  0x65   : > { %1801 = vmatmul.mubr.msk.bf16.gmra.mrb[12].mxu1 %vm313_vm0, %v1963_v51  ;;  %1740 = vmatprep.mubr.msk.bf16.mxu0 %vm313_vm0, %v1964_v52 }
  0x66   : > { %1812 = vmatprep.mubr.msk.bf16.mxu1 %vm313_vm0, %v1965_v53 }
  0x6c   : > { %1741 = vmatmul.mubr.msk.bf16.vlgmr.msra.gmra.mrb[0].mxu0 %vm313_vm0, %v1966_v54 }
  0x6d   : > { %1813 = vmatmul.mubr.msk.bf16.vlgmr.msra.gmra.mrb[0].mxu1 %vm313_vm0, %v1967_v55  ;;  %1744 = vmatprep.mubr.msk.bf16.mxu0 %vm313_vm0, %v1968_v56 }
  0x6e   : > { %1816 = vmatprep.mubr.msk.bf16.mxu1 %vm313_vm0, %v1969_v57 }
  0x74   : > { %1745 = vmatmul.mubr.msk.bf16.gmra.mrb[4].mxu0 %vm313_vm0, %v1970_v58 }
  0x75   : > { %1817 = vmatmul.mubr.msk.bf16.gmra.mrb[4].mxu1 %vm313_vm0, %v1971_v59  ;;  %1748 = vmatprep.mubr.msk.bf16.mxu0 %vm313_vm0, %v1972_v60 }
  0x76   : > { %1820 = vmatprep.mubr.msk.bf16.mxu1 %vm313_vm0, %v1973_v61 }
  0x7c   : > { %1749 = vmatmul.mubr.msk.bf16.gmra.mrb[8].mxu0 %vm313_vm0, %v1974_v62 }
  0x7d   : > { %1821 = vmatmul.mubr.msk.bf16.gmra.mrb[8].mxu1 %vm313_vm0, %v1975_v63  ;;  %1752 = vmatprep.mubr.msk.bf16.mxu0 %vm313_vm0, %v1976_v0 }
  0x7e   : > { %1824 = vmatprep.mubr.msk.bf16.mxu1 %vm313_vm0, %v1977_v1 }
  0x84   : > { %1753 = vmatmul.mubr.msk.bf16.gmra.mrb[12].mxu0 %vm313_vm0, %v1978_v2 }
  0x85   : > { %1825 = vmatmul.mubr.msk.bf16.gmra.mrb[12].mxu1 %vm313_vm0, %v1979_v3 }
 0x13f   : > { %v1742_v4 = vpop.f32.mrb[0].mxu0 }
 0x140   : > { %v1814_v5 = vpop.f32.mrb[0].mxu1  ;;  %v710_v6 = vpop.f32.mrb[1].mxu0 }
 0x141   : > { %v1338_v7 = vmul.f32 %v1814_v5, %v1742_v4  ;;  %v1257_v8 = vpop.f32.mrb[1].mxu1  ;;  %v1743_v9 = vpop.f32.mrb[2].mxu0 }
 0x142   : > { %v1336_v10 = vmul.f32 %v1257_v8, %v710_v6  ;;  %v1815_v11 = vpop.f32.mrb[2].mxu1  ;;  %v713_v12 = vpop.f32.mrb[3].mxu0 }
 0x143   : > { %v1339_v13 = vmul.f32 %v1815_v11, %v1743_v9  ;;  %v1260_v14 = vpop.f32.mrb[3].mxu1 }
 0x144   : > { %v1337_v15 = vmul.f32 %v1260_v14, %v713_v12 }
 0x146   : > { %v1352_v16 = vadd.f32 %v1337_v15, %v1336_v10 }
 0x147   : > { %v1746_v17 = vpop.f32.mrb[4].mxu0 }
 0x148   : > { %v1353_v18 = vadd.f32 %v1352_v16, %v1338_v7  ;;  %v1818_v19 = vpop.f32.mrb[4].mxu1  ;;  %v726_v20 = vpop.f32.mrb[5].mxu0 }
 0x149   : > { %v1342_v21 = vmul.f32 %v1818_v19, %v1746_v17  ;;  %v1273_v22 = vpop.f32.mrb[5].mxu1  ;;  %v1747_v23 = vpop.f32.mrb[6].mxu0 }
 0x14a   : > { %v1340_v24 = vmul.f32 %v1273_v22, %v726_v20  ;;  %v1354_v25 = vadd.f32 %v1353_v18, %v1339_v13  ;;  %v1819_v26 = vpop.f32.mrb[6].mxu1  ;;  %v729_v27 = vpop.f32.mrb[7].mxu0 }
 0x14b   : > { %v1343_v28 = vmul.f32 %v1819_v26, %v1747_v23  ;;  %v1276_v29 = vpop.f32.mrb[7].mxu1 }
 0x14c   : > { %v1355_v30 = vadd.f32 %v1354_v25, %v1340_v24  ;;  %v1341_v31 = vmul.f32 %v1276_v29, %v729_v27 }
 0x14e   : > { %v1356_v32 = vadd.f32 %v1355_v30, %v1341_v31 }
 0x14f   : > { %v1750_v33 = vpop.f32.mrb[8].mxu0 }
 0x150   : > { %v1357_v34 = vadd.f32 %v1356_v32, %v1342_v21  ;;  %v1822_v35 = vpop.f32.mrb[8].mxu1  ;;  %v742_v36 = vpop.f32.mrb[9].mxu0 }
 0x151   : > { %v1346_v37 = vmul.f32 %v1822_v35, %v1750_v33  ;;  %v1289_v38 = vpop.f32.mrb[9].mxu1  ;;  %v1751_v39 = vpop.f32.mrb[10].mxu0 }
 0x152   : > { %v1344_v40 = vmul.f32 %v1289_v38, %v742_v36  ;;  %v1358_v41 = vadd.f32 %v1357_v34, %v1343_v28  ;;  %v1823_v42 = vpop.f32.mrb[10].mxu1  ;;  %v745_v43 = vpop.f32.mrb[11].mxu0 }
 0x153   : > { %v1347_v44 = vmul.f32 %v1823_v42, %v1751_v39  ;;  %v1292_v45 = vpop.f32.mrb[11].mxu1 }
 0x154   : > { %v1359_v46 = vadd.f32 %v1358_v41, %v1344_v40  ;;  %v1345_v47 = vmul.f32 %v1292_v45, %v745_v43 }
 0x156   : > { %v1360_v48 = vadd.f32 %v1359_v46, %v1345_v47 }
 0x157   : > { %v1754_v49 = vpop.f32.mrb[12].mxu0 }
 0x158   : > { %v1361_v50 = vadd.f32 %v1360_v48, %v1346_v37  ;;  %v1826_v51 = vpop.f32.mrb[12].mxu1  ;;  %v758_v52 = vpop.f32.mrb[13].mxu0 }
 0x159   : > { %v1350_v53 = vmul.f32 %v1826_v51, %v1754_v49  ;;  %v1305_v54 = vpop.f32.mrb[13].mxu1  ;;  %v1755_v55 = vpop.f32.mrb[14].mxu0 }
 0x15a   : > { %v1348_v56 = vmul.f32 %v1305_v54, %v758_v52  ;;  %v1362_v57 = vadd.f32 %v1361_v50, %v1347_v44  ;;  %v1827_v58 = vpop.f32.mrb[14].mxu1  ;;  %v761_v59 = vpop.f32.mrb[15].mxu0 }
 0x15b   : > { %v1351_v60 = vmul.f32 %v1827_v58, %v1755_v55  ;;  %v1308_v61 = vpop.f32.mrb[15].mxu1 }
 0x15c   : > { %v1363_v62 = vadd.f32 %v1362_v57, %v1348_v56  ;;  %v1349_v63 = vmul.f32 %v1308_v61, %v761_v59 }
 0x15e   : > { %v1364_v0 = vadd.f32 %v1363_v62, %v1349_v63 }
 0x160   : > { %v1365_v1 = vadd.f32 %v1364_v0, %v1350_v53 }
 0x162   : > { %v1366_v2 = vadd.f32 %v1365_v1, %v1351_v60 }
 0x164   : > { %v1367_v3 = vrot.slane %v1366_v2, 4 }
 0x166   : > { %v1368_v4 = vadd.f32 %v1367_v3, %v1366_v2 }
 0x168   : > { %v1369_v5 = vrot.slane %v1368_v4, 2 }
 0x16a   : > { %v1370_v6 = vadd.f32 %v1369_v5, %v1368_v4 }
 0x16c   : > { %v1371_v7 = vrot.slane %v1370_v6, 1 }
 0x16e   : > { %v1372_v8 = vadd.f32 %v1371_v7, %v1370_v6 }
 0x170   : > { %1373 = vst [vmem:[%s160_s10] sm:$0x1] %v1372_v8 }
 0x171   : > { %1993 = shalt.err (!%p1990_p3)
}
 0x172   : > { %s1994_s28 = scalar_lea.hbm %s2494_s20, 16  ;;  %s1998_s4 = scalar_lea.hbm %s2539_s3, 32 }
 0x173   : > { %p1995_p4 = scmp.ne.s32.totalorder %s2494_s20, %s1994_s28  ;;  %p1999_p9 = scmp.lt.u32.totalorder %s2494_s20, %s2539_s3 }
 0x174   : > { %p2000_p10 = scmp.lt.u32.totalorder %s1998_s4, %s1994_s28  ;;  %p2002_p12 = scmp.lt.u32.totalorder %s1994_s28, %s2494_s20 }
 0x175   : > { %p1996_p7 = pnand %p1995_p4, %p2104_p5 }
 0x176   : > { %p2001_p11 = por %p2000_p10, %p1999_p9 }
 0x177   : > { %p1997_p8 = pneg %p1996_p7 }
 0x178   : > { %p2003_p13 = por %p2002_p12, %p2001_p11 }
 0x17a   : > { %p2004_p0 = pnand %p2003_p13, %p1997_p8 }
 0x17c   : > { %2007 = shalt.err (!%p2004_p0)
}
 0x17d   : > { %1892 = dma.vmem_to_hbm [thread:$0]  (%p2104_p5), %s2496_s11, 16, %s2494_s20, %s1375_s24  }
 0x17e PF: > { %p1898_p1 = scmp.ge.s32.totalorder %s2042_s15, 2  ;;  %s1399_s7 = sand.u32 1, %s2030_s12  }
 0x17f   : > { %s1400_s8 = scalar_lea.sflag [#allocation3], %s1399_s7 }
 0x180   : > { %p1895_p2 = pnand %p1898_p1, %p2108_p6 }
 0x182   : > { %2025 = dma.done.wait (!%p1895_p2), %s1400_s8, 16  }
 0x183   : > { %2027 = vsyncadd (!%p1895_p2), %s1400_s8, 4294967280  ;;  %p13_p3 = scmp.ge.s32.totalorder %s2091_s18, 4   ;;  %s2558_s12 = smov %s2034_s13 }
 0x184   : > { %s2559_s13 = smov %s2038_s14  ;;  %s2560_s14 = smov %s2102_s21 }
 0x185   : > { %s2561_s15 = smov %s2091_s18  ;;  %15 = sbr.rel (!%p13_p3) target bundleno = 3 (0x3), region = 67 }
 0x18c   :  { %1404 = vsyncpa [#allocation3], 1 }
 0x18d   :  { %1406 = vsyncpa [#allocation3 + $0x1], 1 }

</bundles_post_ra>
